<compile_context>
chip_gen: v7x
topology: tpu7x:2x2x1
jax: 0.10.0
libtpu: 0.0.40
codegen_flags: <defaults>
</compile_context>

<pallas_src>
import jax
import jax.numpy as jnp
from jax.experimental import pallas as pl
from jax.experimental.pallas import tpu as pltpu


def _round_up(x, m):
    return ((x + m - 1) // m) * m


def _cdiv(a, b):
    return (a + b - 1) // b


def lora_kernel(x_ref, at_ref, b_ref, o_ref):
    """o = x @ A @ B, with the (alpha/rank) scale pre-folded into A^T.

    x_ref : (tm, in_dim)    batch tile (streamed once per batch tile)
    at_ref: (rank, in_dim)  A^T, scale folded in, fully resident (tiny)
    b_ref : (rank, tn)      out_dim tile of B
    o_ref : (tm, tn)
    """
    # First MXU matmul: contract the last dims of x and A^T -> (tm, rank),
    # f32 accumulation.
    xa = jax.lax.dot_general(
        x_ref[...], at_ref[...],
        dimension_numbers=(((1,), (1,)), ((), ())),
        preferred_element_type=jnp.float32,
    )
    # Keep the tiny (tm, rank) intermediate in f32 for the second matmul
    # (tightens the bf16-streaming numerics at negligible cost).
    out = jnp.dot(xa, b_ref[...].astype(jnp.float32),
                  preferred_element_type=jnp.float32)
    o_ref[...] = out.astype(o_ref.dtype)


def lora_forward(x, A, B, *, alpha, rank, tm=256, tn=512,
                 compute_dtype=None, out_dtype=None):
    """Pallas LoRA forward: (alpha / rank) * (x @ A @ B).

    x: (M, in_dim), A: (in_dim, rank), B: (rank, out_dim).

    compute_dtype: optional streaming dtype for x/A/B (e.g. jnp.bfloat16 -
                   recommended on v6e/v7x; halves HBM bytes, f32 accumulation
                   is kept). Ideally x already arrives in this dtype; if not,
                   the cast is allowed to fuse into the pallas_call inputs.
    out_dtype:     output dtype; defaults to compute_dtype when set (halves
                   output traffic too), else x.dtype.
    """
    M, in_dim = x.shape
    r, out_dim = B.shape
    assert A.shape == (in_dim, r) and r == rank
    scale = float(alpha) / float(rank)

    stream_dtype = jnp.dtype(compute_dtype) if compute_dtype is not None \
        else jnp.dtype(x.dtype)
    if out_dtype is None:
        out_dtype = stream_dtype if compute_dtype is not None else x.dtype
    out_dtype = jnp.dtype(out_dtype)

    # x: no pad, only an (optionally fused) cast. A and B are tiny, so the
    # wrapper-side transpose / scale-fold / cast on them is negligible.
    x_c = x if jnp.dtype(x.dtype) == stream_dtype else x.astype(stream_dtype)
    a_t = (A.astype(jnp.float32).T * scale).astype(stream_dtype)  # (rank, in_dim)
    b_c = B if jnp.dtype(B.dtype) == stream_dtype else B.astype(stream_dtype)

    s_isz = stream_dtype.itemsize
    o_isz = out_dtype.itemsize
    sub = 16 if s_isz < 4 else 8        # sublane alignment for packed dtypes

    # Batch tile: as large as requested but never bigger than the aligned
    # batch. Out_dim tile: lane-dense (multiple of 128).
    tm = max(sub, _round_up(min(tm, _round_up(M, sub)), sub))
    tn = max(128, _round_up(min(tn, _round_up(out_dim, 128)), 128))

    rank_sub = _round_up(rank, sub)
    in_dim_ln = max(_round_up(in_dim, 128), 128)

    def tile_bytes(tm_, tn_):
        x_b = tm_ * in_dim_ln * s_isz
        a_b = rank_sub * in_dim_ln * s_isz
        b_b = rank_sub * tn_ * s_isz
        o_b = tm_ * tn_ * o_isz
        return 2 * (x_b + a_b + b_b + o_b)      # all streams double-buffered

    # Keep the double-buffered working set inside v7x's 64 MiB VMEM with
    # headroom; shrink tm (not tn) so output stores stay lane-dense.
    budget = 48 << 20
    while tile_bytes(tm, tn) > budget and tm > sub:
        tm = max(sub, _round_up(tm // 2, sub))

    # Megacore (v7x: 2 TensorCores): guarantee >= 2 grid steps on the
    # "parallel" batch axis whenever the batch can be split.
    if _cdiv(M, tm) < 2 and M > sub:
        tm = max(sub, _round_up(_cdiv(M, 2), sub))

    grid = (_cdiv(M, tm), _cdiv(out_dim, tn))

    # Explicit scoped-VMEM limit (v5e default is 16 MiB; leave headroom on
    # v7x's 64 MiB physical VMEM).
    vmem_limit = int(min(max(tile_bytes(tm, tn) * 3 // 2, 32 << 20), 64 << 20))

    cost = pl.CostEstimate(
        flops=2 * M * rank * (in_dim + out_dim),
        transcendentals=0,
        bytes_accessed=(M * in_dim * s_isz + in_dim * rank * s_isz
                        + rank * out_dim * s_isz + M * out_dim * o_isz),
    )

    # Grid order: i (batch) outer / parallel, j (out_dim) inner / arbitrary.
    # x's index_map MUST stay independent of j (single-pass x streaming).
    return pl.pallas_call(
        lora_kernel,
        out_shape=jax.ShapeDtypeStruct((M, out_dim), out_dtype),
        grid_spec=pltpu.PrefetchScalarGridSpec(
            num_scalar_prefetch=0,
            grid=grid,
            in_specs=[
                pl.BlockSpec((tm, in_dim), lambda i, j: (i, 0)),     # x tile
                pl.BlockSpec((rank, in_dim), lambda i, j: (0, 0)),   # A^T (whole)
                pl.BlockSpec((rank, tn), lambda i, j: (0, j)),       # B tile
            ],
            out_specs=pl.BlockSpec((tm, tn), lambda i, j: (i, j)),
        ),
        compiler_params=pltpu.CompilerParams(
            dimension_semantics=("parallel", "arbitrary"),
            vmem_limit_bytes=vmem_limit,
            allow_input_fusion=[True, True, True],
        ),
        cost_estimate=cost,
    )(x_c, a_t, b_c)


if __name__ == "__main__":
    # Small shapes consistent with the module's forward.
    batch, in_dim, out_dim, rank, alpha = 16, 32, 32, 8, 16

    key = jax.random.PRNGKey(0)
    kx, ka, kb = jax.random.split(key, 3)

    x = jax.random.normal(kx, (batch, in_dim), dtype=jnp.float32)

    # Deterministic parameter init mirroring LoRALayer.__init__:
    #   A ~ randn(in_dim, rank) / sqrt(rank),  B = zeros(rank, out_dim)
    std_dev = 1.0 / jnp.sqrt(jnp.float32(rank))
    A = jax.random.normal(ka, (in_dim, rank), dtype=jnp.float32) * std_dev
    B = jnp.zeros((rank, out_dim), dtype=jnp.float32)

    hi = jax.lax.Precision.HIGHEST

    def ref_fn(x_, A_, B_):
        return (alpha / rank) * jnp.matmul(
            jnp.matmul(x_, A_, precision=hi), B_, precision=hi)

    # 1) Faithful init: B = 0 -> output all zeros (same as the PyTorch module).
    out = jax.block_until_ready(lora_forward(x, A, B, alpha=alpha, rank=rank))
    ref = ref_fn(x, A, B)
    assert out.shape == ref.shape
    assert jnp.allclose(out, ref, atol=1e-5, rtol=1e-5)

    # 2) Non-zero B so the MXU path is actually exercised. (Tolerance covers
    #    possible multi-pass bf16 handling of f32 MXU matmuls.)
    B_nz = jax.random.normal(kb, (rank, out_dim), dtype=jnp.float32) * 0.02
    out_nz = jax.block_until_ready(
        lora_forward(x, A, B_nz, alpha=alpha, rank=rank))
    ref_nz = ref_fn(x, A, B_nz)
    assert jnp.allclose(out_nz, ref_nz, atol=2e-3, rtol=2e-3)

    # 3) bf16 streaming + bf16 output (halves x/B/out HBM traffic; f32 acc).
    out_bf = jax.block_until_ready(
        lora_forward(x, A, B_nz, alpha=alpha, rank=rank,
                     compute_dtype=jnp.bfloat16))
    assert out_bf.dtype == jnp.bfloat16
    assert jnp.allclose(out_bf.astype(jnp.float32), ref_nz,
                        atol=3e-2, rtol=3e-2)

    # 4) Ragged batch / out_dim handled in-pipeline (no wrapper padding).
    xr = jax.random.normal(kx, (13, in_dim), dtype=jnp.float32)
    Br = jax.random.normal(kb, (rank, 50), dtype=jnp.float32) * 0.02
    out_r = jax.block_until_ready(
        lora_forward(xr, A, Br, alpha=alpha, rank=rank))
    ref_r = ref_fn(xr, A, Br)
    assert out_r.shape == ref_r.shape
    assert jnp.allclose(out_r, ref_r, atol=2e-3, rtol=2e-3)

    print("KERNEL_OK")
</pallas_src>

<mosaic_0001>
module attributes {stable_mosaic.version = 11 : i64} {
  func.func @lora_kernel(%arg0: i32, %arg1: i32, %arg2: memref<8x32xf32, #tpu.memory_space<vmem>>, %arg3: memref<8x32xf32, #tpu.memory_space<vmem>>, %arg4: memref<8x128xf32, #tpu.memory_space<vmem>>, %arg5: memref<8x128xf32, #tpu.memory_space<vmem>>) attributes {dimension_semantics = [#tpu.dimension_semantics<parallel>, #tpu.dimension_semantics<arbitrary>], iteration_bounds = array<i64: 2, 1>, scalar_prefetch = 0 : i64, scratch_operands = 0 : i64, tpu.core_type = #tpu.core_type<tc>, window_params = [{transform_indices = @transform_0, window_bounds = array<i64: 8, 32>}, {pipeline_mode = #tpu.pipeline_mode<synchronous>, transform_indices = @transform_1, window_bounds = array<i64: 8, 32>}, {transform_indices = @transform_2, window_bounds = array<i64: 8, 128>}, {transform_indices = @transform_3, window_bounds = array<i64: 8, 128>}]} {
    %c0 = arith.constant 0 : index
    %c0_0 = arith.constant 0 : index
    %0 = vector.load %arg2[%c0, %c0_0] : memref<8x32xf32, #tpu.memory_space<vmem>>, vector<8x32xf32>
    %c0_1 = arith.constant 0 : index
    %c0_2 = arith.constant 0 : index
    %1 = vector.load %arg3[%c0_1, %c0_2] : memref<8x32xf32, #tpu.memory_space<vmem>>, vector<8x32xf32>
    %cst = arith.constant dense<0.000000e+00> : vector<8x8xf32>
    %2 = tpu.matmul %0, %1, %cst {dimension_numbers = #tpu.dot_dimension_numbers<[1], [1], [0], [0], [0, 0, 1, 0], [], []>} : vector<8x32xf32>, vector<8x32xf32>, vector<8x8xf32> -> vector<8x8xf32>
    %c0_3 = arith.constant 0 : index
    %c0_4 = arith.constant 0 : index
    %3 = vector.load %arg4[%c0_3, %c0_4] : memref<8x128xf32, #tpu.memory_space<vmem>>, vector<8x128xf32>
    %cst_5 = arith.constant dense<0.000000e+00> : vector<8x128xf32>
    %4 = tpu.matmul %2, %3, %cst_5 {dimension_numbers = #tpu.dot_dimension_numbers<[1], [0], [0], [1], [0, 0, 1, 1], [], []>} : vector<8x8xf32>, vector<8x128xf32>, vector<8x128xf32> -> vector<8x128xf32>
    %c0_6 = arith.constant 0 : index
    %c0_7 = arith.constant 0 : index
    %5 = vector.load %arg5[%c0_6, %c0_7] : memref<8x128xf32, #tpu.memory_space<vmem>>, vector<8x128xf32>
    tpu.vector_store %arg5[%c0_6, %c0_7], %4 {strides = array<i32>} : memref<8x128xf32, #tpu.memory_space<vmem>>, vector<8x128xf32>,
    return
  }
  func.func @transform_0(%arg0: i32, %arg1: i32) -> (i32, i32) {
    %c0_i32 = arith.constant 0 : i32
    %c0_i32_0 = arith.constant 0 : i32
    return %arg0, %c0_i32 : i32, i32
  }
  func.func @transform_1(%arg0: i32, %arg1: i32) -> (i32, i32) {
    %c0_i32 = arith.constant 0 : i32
    %c0_i32_0 = arith.constant 0 : i32
    %c0_i32_1 = arith.constant 0 : i32
    return %c0_i32, %c0_i32_0 : i32, i32
  }
  func.func @transform_2(%arg0: i32, %arg1: i32) -> (i32, i32) {
    %c0_i32 = arith.constant 0 : i32
    %c0_i32_0 = arith.constant 0 : i32
    return %c0_i32, %arg1 : i32, i32
  }
  func.func @transform_3(%arg0: i32, %arg1: i32) -> (i32, i32) {
    %c0_i32 = arith.constant 0 : i32
    return %arg0, %arg1 : i32, i32
  }
}

</mosaic_0001>

<bundles_post_ra>
// kernel: tpu_custom_call.1
= control target key start
LH: loop header
LB: loop body
LE: loop exit
PB: predicated region body
PF: predicated region fallthrough
CT: control target
= control target key end

     0   :  { %8 = vsyncpa [#allocation3], 0  ;;  %s1064_s0 = inlined_call_operand.hbm [shape: f32[16,32], index: 0, kind: input, shape index: {}]   ;;  %s1065_s1 = inlined_call_operand.hbm [shape: f32[8,32], index: 1, kind: input, shape index: {}]   ;;  %s1066_s2 = inlined_call_operand.hbm [shape: f32[8,32], index: 2, kind: input, shape index: {}]   ;;  %s1067_s3 = inlined_call_operand.hbm [shape: f32[16,32], index: 3, kind: output, shape index: {}]  }
   0x1   :  { %10 = vsyncpa [#allocation3 + $0x1], 0 }
   0x2   :  { %11 = vsyncpa [#allocation6], 0 }
   0x3   :  { %12 = vsyncpa [#allocation4], 0 }
   0x4   :  { %14 = vsyncpa [#allocation4 + $0x1], 0  ;;  %s821_s12 = smov 0   ;;  %s823_s13 = smov 0  }
   0x5   :  { %s825_s14 = smov 0   ;;  %s827_s15 = smov 0  }
   0x6   :  { %s829_s16 = smov 0   ;;  %s831_s17 = smov 0  }
   0x7 LB: > { %s502_s18 = sadd.s32 4294967295, %s793_s17   ;;  %s503_s19 = sadd.s32 4294967294, %s793_s17   ;;  %s793_s17 = sphi %s831_s17, %s20_s17   ;;  %s789_s16 = sphi %s829_s16, %s1090_s16   ;;  %s785_s15 = sphi %s827_s15, %s1089_s15   ;;  %s781_s14 = sphi %s825_s14, %s1088_s14   ;;  %s777_s13 = sphi %s823_s13, %s1087_s13   ;;  %s773_s12 = sphi %s821_s12, %s1086_s12  }
   0x8   : > { %p52_p0 = scmp.ne.s32.totalorder %s777_s13, %s773_s12  ;;  %p855_p1 = scmp.eq.s32.totalorder %s502_s18, 0 }
   0x9   : > { %p859_p2 = scmp.eq.s32.totalorder %s502_s18, 1  ;;  %p131_p3 = scmp.eq.s32.totalorder %s503_s19, 1 }
   0xa   : > { %s1072_s20 = scalar_select %p855_p1, 1, 0 }
   0xb   : > { %s1073_s21 = scalar_select %p859_p2, 1, 0 }
   0xc   : > { %p865_p4 = por %p855_p1, %p52_p0  ;;  %p504_p5 = scmp.ge.s32.totalorder %s793_s17, 1 }
   0xd   : > { %p870_p6 = por %p131_p3, %p52_p0  ;;  %p138_p7 = scmp.lt.s32.totalorder %s793_s17, 3 }
   0xe   : > { %s1074_s22 = scalar_select %p865_p4, 1, 0 }
   0xf   : > { %s1075_s23 = scalar_select %p870_p6, 1, 0 }
  0x10   : > { %p875_p8 = pnand %p504_p5, %p138_p7  ;;  %s795_s25 = smov [#allocation5]  }
  0x11   : > { %s151_s26 = sshll.u32 %s795_s25, 4  ;;  %s796_s27 = smov [#allocation7]   ;;  %s152_s26 = int_to_ptr.vmem [resolvable:$true] %s151_s26 }
  0x12   : > { %s1076_s24 = scalar_select %p875_p8, 1, 0 }
  0x13   : > { %p548_p10 = pneg %p875_p8  ;;  %s164_s28 = sshll.u32 %s796_s27, 4  ;;  %s888_s28 = int_to_ptr.vmem [resolvable:$true] %s164_s28 }
  0x14   : > { %s621_s5 = scalar_lea.hbm %s1065_s1, 128 }
  0x15   : > { %p884_p11 = pnand %p548_p10, %p855_p1  ;;  %p622_p12 = scmp.ne.s32.totalorder %s1065_s1, %s621_s5 }
  0x16   : > { %p628_p5 = scmp.lt.u32.totalorder %s621_s5, %s1065_s1 }
  0x17   : > { %p623_p13 = pneg %p884_p11 }
  0x19   : > { %p624_p0 = pnand %p623_p13, %p622_p12 }
  0x1b   : > { %p625_p3 = pneg %p624_p0 }
  0x1d   : > { %p630_p7 = pnand %p628_p5, %p625_p3 }
  0x1f   : > { %633 = shalt.err (!%p630_p7)
}
  0x20   : > { %s634_s10 = scalar_lea.vmem %s152_s26, 128  ;;  %p642_p1 = scmp.lt.s32.totalorder %s152_s26, %s152_s26 }
  0x21   : > { %p635_p10 = scmp.ne.s32.totalorder %s152_s26, %s634_s10  ;;  %p643_p4 = scmp.lt.s32.totalorder %s634_s10, %s634_s10 }
  0x23   : > { %p637_p9 = pnand %p635_p10, %p623_p13  ;;  %p644_p8 = por %p643_p4, %p642_p1 }
  0x25   : > { %p638_p6 = pneg %p637_p9 }
  0x27   : > { %p645_p2 = pnand %p644_p8, %p638_p6 }
  0x29   : > { %648 = shalt.err (!%p645_p2)
}
  0x2a   : > { %551 = dma.hbm_to_vmem [thread:$0]  (!%p884_p11), %s1065_s1, 128, %s152_s26, [#allocation6]  }
  0x2b   : > { %s649_s27 = scalar_lea.hbm %s1066_s2, 128 }
  0x2c   : > { %p650_p9 = scmp.ne.s32.totalorder %s1066_s2, %s649_s27  ;;  %p656_p2 = scmp.lt.u32.totalorder %s649_s27, %s1066_s2 }
  0x2e   : > { %p652_p1 = pnand %p650_p9, %p623_p13 }
  0x30   : > { %p653_p4 = pneg %p652_p1 }
  0x32   : > { %p658_p6 = pnand %p656_p2, %p653_p4 }
  0x34   : > { %661 = shalt.err (!%p658_p6)
}
  0x35   : > { %s662_s26 = scalar_lea.vmem %s888_s28, 128  ;;  %p670_p3 = scmp.lt.s32.totalorder %s888_s28, %s888_s28 }
  0x36   : > { %p663_p8 = scmp.ne.s32.totalorder %s888_s28, %s662_s26  ;;  %p671_p5 = scmp.lt.s32.totalorder %s662_s26, %s662_s26 }
  0x38   : > { %p665_p12 = pnand %p663_p8, %p623_p13  ;;  %p672_p7 = por %p671_p5, %p670_p3 }
  0x3a   : > { %p666_p0 = pneg %p665_p12 }
  0x3c   : > { %p673_p10 = pnand %p672_p7, %p666_p0 }
  0x3e   : > { %676 = shalt.err (!%p673_p10)
}
  0x3f   : > { %554 = dma.hbm_to_vmem [thread:$0]  (!%p884_p11), %s1066_s2, 128, %s888_s28, [#allocation6]  }
  0x40   : > { %s32_s9 = sadd.s32 1, %s789_s16  ;;  %s39_s10 = sadd.s32 1, %s781_s14 }
  0x41   : > { %p34_p13 = scmp.ge.s32.totalorder %s32_s9, 2  ;;  %p46_p9 = scmp.ne.s32.totalorder %s781_s14, %s777_s13 }
  0x42   : > { %p47_p1 = scmp.eq.s32.totalorder %s793_s17, 0  ;;  %p565_p4 = scmp.lt.s32.totalorder %s793_s17, 2 }
  0x43   : > { %s1092_s9 = smov (%p34_p13, %s32_s9), 0  ;;  %p1078_p6 = scmp.ne.s32.totalorder %s1073_s21, 0 }
  0x44   : > { %p48_p2 = por %p47_p1, %p46_p9  ;;  %s36_s11 = ssub.s32 %s789_s16, %s1092_s9 }
  0x45   : > { %p947_p8 = por %p1078_p6, %p46_p9  ;;  %s175_s18 = sand.u32 1, %s781_s14  }
  0x46   : > { %p37_p12 = scmp.eq.s32.totalorder %s36_s11, 0  ;;  %s508_s28 = sshll.u32 %s175_s18, 3 }
  0x47   : > { %s509_s19 = sshll.u32 %s789_s16, 7  ;;  %s179_s21 = scalar_lea.vmem [#allocation2], %s508_s28 }
  0x48   : > { %s956_s25 = scalar_select %p37_p12, %s781_s14, %s39_s10  }
  0x49   : > { %s961_s4 = scalar_lea.hbm %s1064_s0, %s509_s19  ;;  %s186_s5 = sshll.u32 %s179_s21, 4  ;;  %s969_s5 = int_to_ptr.vmem [resolvable:$true] %s186_s5 }
  0x4a   : > { %p965_p11 = pnand %p565_p4, %p48_p2  ;;  %s176_s26 = scalar_lea.sflag [#allocation3], %s175_s18 }
  0x4b   : > { %s677_s7 = scalar_lea.hbm %s961_s4, 128  ;;  %s682_s11 = scalar_lea.hbm %s1064_s0, 256 }
  0x4c   : > { %p678_p0 = scmp.ne.s32.totalorder %s961_s4, %s677_s7  ;;  %p679_p3 = pneg %p965_p11 }
  0x4d   : > { %p683_p10 = scmp.lt.u32.totalorder %s961_s4, %s1064_s0  ;;  %p684_p13 = scmp.lt.u32.totalorder %s682_s11, %s677_s7 }
  0x4e   : > { %p680_p5 = pnand %p679_p3, %p678_p0  ;;  %p686_p1 = scmp.lt.u32.totalorder %s677_s7, %s961_s4 }
  0x4f   : > { %p685_p9 = por %p684_p13, %p683_p10 }
  0x50   : > { %p681_p7 = pneg %p680_p5 }
  0x51   : > { %p687_p4 = por %p686_p1, %p685_p9 }
  0x53   : > { %p688_p2 = pnand %p687_p4, %p681_p7 }
  0x55   : > { %691 = shalt.err (!%p688_p2)
}
  0x56   : > { %s692_s18 = scalar_lea.vmem %s969_s5, 128  ;;  %s797_s27 = smov [#allocation2]  }
  0x57   : > { %p693_p6 = scmp.ne.s32.totalorder %s969_s5, %s692_s18  ;;  %s697_s30 = sshll.u32 %s797_s27, 4  ;;  %s698_s30 = int_to_ptr.vmem [resolvable:$false] %s697_s30 }
  0x58   : > { %s699_s21 = scalar_lea.vmem %s698_s30, 256  ;;  %p700_p5 = scmp.lt.s32.totalorder %s969_s5, %s698_s30 }
  0x59   : > { %p695_p12 = pnand %p693_p6, %p679_p3  ;;  %p701_p10 = scmp.lt.s32.totalorder %s699_s21, %s692_s18 }
  0x5b   : > { %p696_p0 = pneg %p695_p12  ;;  %p702_p13 = por %p701_p10, %p700_p5 }
  0x5d   : > { %p703_p9 = pnand %p702_p13, %p696_p0 }
  0x5f   : > { %706 = shalt.err (!%p703_p9)
}
  0x60   : > { %558 = dma.hbm_to_vmem [thread:$0]  (!%p965_p11), %s961_s4, 128, %s969_s5, %s176_s26  }
  0x61   : > { %p1081_p7 = scmp.ne.s32.totalorder %s1076_s24, 0 }
  0x62   : > { %s999_s7 = sand.u32 (!%p1081_p7), 1, %s777_s13   ;;  %p1082_p3 = scmp.ne.s32.totalorder (!%p1081_p7), %s1074_s22, 0 }
  0x63   : > { %195 = sbr.rel (%p1081_p7) target bundleno = 554 (0x22a), region = 32  ;;  %s511_s8 = sshll.u32 (!%p1081_p7), %s999_s7, 3 }
  0x64   : > { %s198_s10 = scalar_lea.sflag (!%p1081_p7), [#allocation3], %s999_s7  ;;  %s201_s11 = scalar_lea.vmem (!%p1081_p7), [#allocation2], %s511_s8 }
  0x6a   : > { %760 = dma.done.wait (%p1082_p3), %s198_s10, 128  }
  0x6b   : > { %762 = vsyncadd (%p1082_p3), %s198_s10, 4294967168  ;;  %p1083_p1 = scmp.ne.s32.totalorder %s1072_s20, 0 }
  0x6d   : > { %764 = dma.done.wait (%p1083_p1), [#allocation6], 256  }
  0x6e   : > { %766 = vsyncadd (%p1083_p1), [#allocation6], 4294967040  ;;  %v798_v0 = vmov 0.0   ;;  %vm799_vm0 = vmmov 0   ;;  %vm234_vm1 = vcmask 261120   ;;  %v233_v1 = vld [vmem:[#allocation5] sm:$0xff] }
  0x6f   : > { %526 = vmatprep.subr.mxu0 %v798_v0  ;;  %528 = vmatprep.mubr.msk.f32.mxu0 %vm799_vm0, %v798_v0  ;;  %v232_v2 = vld [vmem:[%s201_s11] sm:$0xff]  ;;  %v311_v3 = vld [vmem:[#allocation7] sm:$0xff]  ;;  %vm312_vm2 = vcmask 64512   ;;  %s231_s20 = scalar_lea.vmem [#allocation8], %s511_s8  ;;  %s519_s24 = sshll.u32 %s785_s15, 7 }
  0x70   : > { %531 = vmatprep.subr.mxu1 %v798_v0  ;;  %533 = vmatprep.mubr.msk.f32.mxu1 %vm799_vm0, %v798_v0  ;;  %s402_s22 = sshll.u32 %s231_s20, 4  ;;  %s1017_s6 = scalar_lea.hbm %s1067_s3, %s519_s24  ;;  %s1012_s22 = int_to_ptr.vmem [resolvable:$true] %s402_s22 }
  0x71   : > { %527 = vmatpush3.xpose.msk.msra.mxu0 %vm234_vm1, %v233_v1  ;;  %532 = vmatpush3.msra.mxu1 %v311_v3  ;;  %s388_s26 = scalar_lea.sflag [#allocation4], %s999_s7  ;;  %s707_s28 = scalar_lea.vmem %s1012_s22, 128 }
  0x72   : > { %p708_p11 = scmp.ne.s32.totalorder %s1012_s22, %s707_s28  ;;  %s800_s15 = smov [#allocation8]  }
  0x73   : > { %s711_s19 = sshll.u32 %s800_s15, 4  ;;  %s712_s19 = int_to_ptr.vmem [resolvable:$false] %s711_s19 }
  0x74   : > { %529 = vmatmul.mubr.msk.f32.vlgmr.msra.gmra.mrb[0].mxu0 %vm234_vm1, %v232_v2  ;;  %p709_p4 = pnand %p708_p11, %p947_p8  ;;  %s713_s18 = scalar_lea.vmem %s712_s19, 256 }
  0x75   : > { %p714_p6 = scmp.lt.s32.totalorder %s1012_s22, %s712_s19  ;;  %p715_p12 = scmp.lt.s32.totalorder %s713_s18, %s707_s28 }
  0x76   : > { %p710_p2 = pneg %p709_p4 }
  0x77   : > { %p716_p0 = por %p715_p12, %p714_p6 }
  0x79   : > { %p717_p5 = pnand %p716_p0, %p710_p2 }
 0x147   : > { %v307_v4 = vpop.f32.mrb[0].mxu0 }
 0x148   : > { %v530_v5 = vpop.f32.mrb[1].mxu0  ;;  %534 = vmatmul.mubr.msk.f32.vlgmr.msra.gmra.mrb[0].mxu1 %vm312_vm2, %v307_v4 }
 0x21b   : > { %v382_v6 = vpop.f32.mrb[0].mxu1 }
 0x21c   : > { %386 = vst [vmem:[%s231_s20] sm:$0xff] %v382_v6  ;;  %v535_v7 = vpop.f32.mrb[1].mxu1 }
 0x21d   : > { %720 = shalt.err (!%p717_p5)
}
 0x21e   : > { %s721_s27 = scalar_lea.hbm %s1017_s6, 128  ;;  %s725_s7 = scalar_lea.hbm %s1067_s3, 256 }
 0x21f   : > { %p722_p10 = scmp.ne.s32.totalorder %s1017_s6, %s721_s27  ;;  %p726_p7 = scmp.lt.u32.totalorder %s1017_s6, %s1067_s3 }
 0x220   : > { %p727_p3 = scmp.lt.u32.totalorder %s725_s7, %s721_s27  ;;  %p729_p11 = scmp.lt.u32.totalorder %s721_s27, %s1017_s6 }
 0x221   : > { %p723_p13 = pnand %p722_p10, %p947_p8 }
 0x222   : > { %p728_p1 = por %p727_p3, %p726_p7 }
 0x223   : > { %p724_p9 = pneg %p723_p13 }
 0x224   : > { %p730_p4 = por %p729_p11, %p728_p1 }
 0x226   : > { %p731_p2 = pnand %p730_p4, %p724_p9 }
 0x228   : > { %734 = shalt.err (!%p731_p2)
}
 0x229   : > { %546 = dma.vmem_to_hbm [thread:$0]  (%p947_p8), %s1012_s22, 128, %s1017_s6, %s388_s26  }
 0x22a PF: > { %s414_s11 = sand.u32 1, %s773_s12   ;;  %p1084_p6 = scmp.ne.s32.totalorder %s1075_s23, 0 }
 0x22b   : > { %p1085_p12 = scmp.ge.s32.totalorder %s793_s17, 2  ;;  %s415_s20 = scalar_lea.sflag [#allocation4], %s414_s11 }
 0x22d   : > { %p560_p0 = pnand %p1085_p12, %p1084_p6 }
 0x22f   : > { %768 = dma.done.wait (!%p560_p0), %s415_s20, 128  }
 0x230   : > { %770 = vsyncadd (!%p560_p0), %s415_s20, 4294967168  ;;  %s20_s17 = sadd.s32 1, %s793_s17   ;;  %s1086_s12 = smov %s777_s13 }
 0x231   : > { %p17_p5 = scmp.ge.s32.totalorder %s20_s17, 4   ;;  %s1087_s13 = smov %s781_s14 }
 0x232   : > { %s1088_s14 = smov %s956_s25  ;;  %s1089_s15 = smov %s789_s16 }
 0x233   : > { %s1090_s16 = smov %s1092_s9  ;;  %19 = sbr.rel (!%p17_p5) target bundleno = 7 (0x7), region = 86 }
 0x23a   :  { %420 = vsyncpa [#allocation3], 1 }
 0x23b   :  { %422 = vsyncpa [#allocation3 + $0x1], 1 }
 0x23c   :  { %423 = vsyncpa [#allocation6], 1 }
 0x23d   :  { %424 = vsyncpa [#allocation4], 1 }
 0x23e   :  { %426 = vsyncpa [#allocation4 + $0x1], 1 }

</bundles_post_ra>
